<compile_context>
chip_gen: v5e
topology: v5e:2x2
jax: 0.10.0
libtpu: 0.0.40
codegen_flags: <defaults>
</compile_context>

<pallas_src>
import jax
import jax.numpy as jnp
from jax import lax
from jax.experimental import pallas as pl
from jax.experimental.pallas import tpu as pltpu

_LANE = 128          # vreg lane width
_TILE_ROWS = 1024    # 1024 x 128 x 4B = 512 KiB per block
_PALLAS_MIN_ELEMS = 32 * 1024   # below this, plain jnp is cheaper than a launch


def _round_up(x: int, m: int) -> int:
    return (x + m - 1) // m * m


def _make_clip_kernel(height: int, width: int, dtype):
    """Elementwise clip kernel over a lane-dense (tile_rows, 128) block."""

    def clip_kernel(x_ref, o_ref):
        # Coordinate id per lane: 0..3 repeating (128 % 4 == 0 so the pattern
        # is consistent across every row of the flattened slab).
        lane_idx = lax.broadcasted_iota(jnp.int32, (1, _LANE), dimension=1)
        coord = lane_idx % 4

        zero = jnp.asarray(0.0, dtype)
        neg_inf = jnp.asarray(-jnp.inf, dtype)
        pos_inf = jnp.asarray(jnp.inf, dtype)
        w_max = jnp.asarray(width - 1, dtype)
        h_max = jnp.asarray(height - 1, dtype)

        # (1, 128) bound rows; broadcast along sublanes against the tile.
        lo = jnp.where(coord < 2, zero, neg_inf)
        hi = jnp.where(coord == 2, w_max, jnp.where(coord == 3, h_max, pos_inf))

        x = x_ref[...]
        o_ref[...] = jnp.minimum(jnp.maximum(x, lo), hi).astype(o_ref.dtype)

    return clip_kernel


def _clip_boxes_jnp(boxes: jax.Array, height: int, width: int) -> jax.Array:
    """Plain-JAX reference / small-tensor fallback."""
    dt = boxes.dtype
    x1 = jnp.maximum(boxes[..., 0], jnp.asarray(0.0, dt))
    y1 = jnp.maximum(boxes[..., 1], jnp.asarray(0.0, dt))
    x2 = jnp.minimum(boxes[..., 2], jnp.asarray(width - 1, dt))
    y2 = jnp.minimum(boxes[..., 3], jnp.asarray(height - 1, dt))
    return jnp.stack([x1, y1, x2, y2], axis=-1).astype(dt)


def _clip_boxes_pallas(boxes: jax.Array, height: int, width: int) -> jax.Array:
    orig_shape = boxes.shape
    dtype = boxes.dtype
    total = boxes.size

    # Flatten to a lane-dense slab: (rows, 128).
    flat = boxes.reshape(-1)
    padded_total = _round_up(total, _LANE)
    if padded_total != total:
        flat = jnp.pad(flat, (0, padded_total - total))
    rows = padded_total // _LANE
    slab = flat.reshape(rows, _LANE)

    # Tile rows: big tiles for DMA efficiency, shrunk for small inputs.
    tile_rows = min(_TILE_ROWS, _round_up(rows, 8))
    grid = (pl.cdiv(rows, tile_rows),)

    kernel = _make_clip_kernel(height, width, dtype)
    out = pl.pallas_call(
        kernel,
        out_shape=jax.ShapeDtypeStruct((rows, _LANE), dtype),
        grid=grid,
        in_specs=[pl.BlockSpec((tile_rows, _LANE), lambda i: (i, 0))],
        out_specs=pl.BlockSpec((tile_rows, _LANE), lambda i: (i, 0)),
        input_output_aliases={0: 0},
        compiler_params=pltpu.CompilerParams(
            dimension_semantics=("parallel",),
        ),
    )(slab)

    return out.reshape(-1)[:total].reshape(orig_shape)


def clip_boxes(boxes: jax.Array, img: jax.Array, *, use_pallas=None) -> jax.Array:
    """Pallas equivalent of ClipBoxes.forward(boxes, img)."""
    _, _, height, width = img.shape  # NCHW; only H, W matter
    if use_pallas is None:
        use_pallas = boxes.size >= _PALLAS_MIN_ELEMS
    if not use_pallas:
        return _clip_boxes_jnp(boxes, height, width)
    return _clip_boxes_pallas(boxes, height, width)


if __name__ == "__main__":
    key = jax.random.PRNGKey(0)
    k_small, k_big, k_img = jax.random.split(key, 3)

    B, C, H, W = 2, 4, 16, 16
    img = jax.random.normal(k_img, (B, C, H, W), dtype=jnp.float32)

    # --- Small case (module-scale shapes), forced through the Pallas path. ---
    N_SMALL = 8
    boxes_small = jax.random.uniform(
        k_small, (B, N_SMALL, 4), dtype=jnp.float32, minval=-10.0, maxval=30.0
    )
    ref_small = _clip_boxes_jnp(boxes_small, H, W)
    out_small = jax.block_until_ready(clip_boxes(boxes_small, img, use_pallas=True))
    assert out_small.shape == boxes_small.shape
    assert jnp.allclose(out_small, ref_small), "small-case mismatch vs reference"

    # --- Larger, lane-unaligned case: exercises padding + multi-tile grid. ---
    N_BIG = 70000  # 2*70000*4 = 560000 elems -> 4375 rows -> 5 grid steps
    boxes_big = jax.random.uniform(
        k_big, (B, N_BIG, 4), dtype=jnp.float32, minval=-10.0, maxval=30.0
    )
    ref_big = _clip_boxes_jnp(boxes_big, H, W)
    out_big = jax.block_until_ready(clip_boxes(boxes_big, img))
    assert out_big.shape == boxes_big.shape
    assert jnp.allclose(out_big, ref_big), "big-case mismatch vs reference"

    print("KERNEL_OK")
</pallas_src>

<mosaic_0001>
module attributes {stable_mosaic.version = 11 : i64} {
  func.func @clip_kernel(%arg0: i32, %arg1: memref<8x128xf32, #tpu.memory_space<vmem>>, %arg2: memref<8x128xf32, #tpu.memory_space<vmem>>) attributes {dimension_semantics = [#tpu.dimension_semantics<parallel>], iteration_bounds = array<i64: 1>, scalar_prefetch = 0 : i64, scratch_operands = 0 : i64, tpu.core_type = #tpu.core_type<tc>, window_params = [{transform_indices = @transform_0, window_bounds = array<i64: 8, 128>}, {transform_indices = @transform_1, window_bounds = array<i64: 8, 128>}]} {
    %0 = tpu.iota {dimensions = array<i32: 1>} : vector<1x128xi32>
    %c4_i32 = arith.constant 4 : i32
    %c0_i32 = arith.constant 0 : i32
    %1 = arith.cmpi eq, %c4_i32, %c0_i32 : i32
    %c1_i32 = arith.constant 1 : i32
    %2 = arith.select %1, %c1_i32, %c4_i32 : i32
    %3 = vector.broadcast %2 : i32 to vector<1x128xi32>
    %4 = arith.remsi %0, %3 : vector<1x128xi32>
    %c0_i32_0 = arith.constant 0 : i32
    %5 = vector.broadcast %c0_i32_0 : i32 to vector<1x128xi32>
    %6 = arith.cmpi ne, %4, %5 : vector<1x128xi32>
    %c0_i32_1 = arith.constant 0 : i32
    %7 = vector.broadcast %c0_i32_1 : i32 to vector<1x128xi32>
    %8 = arith.cmpi slt, %4, %7 : vector<1x128xi32>
    %c0_i32_2 = arith.constant 0 : i32
    %9 = arith.cmpi slt, %2, %c0_i32_2 : i32
    %10 = vector.broadcast %9 : i1 to vector<1x128xi1>
    %11 = vector.broadcast %10 : vector<1x128xi1> to vector<1x128xi1>
    %12 = arith.xori %8, %11 : vector<1x128xi1>
    %13 = arith.andi %12, %6 : vector<1x128xi1>
    %14 = vector.broadcast %2 : i32 to vector<1x128xi32>
    %15 = arith.addi %4, %14 : vector<1x128xi32>
    %16 = arith.select %13, %15, %4 : vector<1x128xi1>, vector<1x128xi32>
    %c2_i32 = arith.constant 2 : i32
    %17 = vector.broadcast %c2_i32 : i32 to vector<1x128xi32>
    %18 = arith.cmpi slt, %16, %17 : vector<1x128xi32>
    %cst = arith.constant 0.000000e+00 : f32
    %cst_3 = arith.constant 0xFF800000 : f32
    %19 = vector.broadcast %cst : f32 to vector<1x128xf32>
    %20 = vector.broadcast %cst_3 : f32 to vector<1x128xf32>
    %21 = arith.select %18, %19, %20 : vector<1x128xi1>, vector<1x128xf32>
    %c2_i32_4 = arith.constant 2 : i32
    %22 = vector.broadcast %c2_i32_4 : i32 to vector<1x128xi32>
    %23 = arith.cmpi eq, %16, %22 : vector<1x128xi32>
    %c3_i32 = arith.constant 3 : i32
    %24 = vector.broadcast %c3_i32 : i32 to vector<1x128xi32>
    %25 = arith.cmpi eq, %16, %24 : vector<1x128xi32>
    %cst_5 = arith.constant 1.500000e+01 : f32
    %cst_6 = arith.constant 0x7F800000 : f32
    %26 = vector.broadcast %cst_5 : f32 to vector<1x128xf32>
    %27 = vector.broadcast %cst_6 : f32 to vector<1x128xf32>
    %28 = arith.select %25, %26, %27 : vector<1x128xi1>, vector<1x128xf32>
    %cst_7 = arith.constant 1.500000e+01 : f32
    %29 = vector.broadcast %cst_7 : f32 to vector<1x128xf32>
    %30 = arith.select %23, %29, %28 : vector<1x128xi1>, vector<1x128xf32>
    %c0 = arith.constant 0 : index
    %c0_8 = arith.constant 0 : index
    %31 = vector.load %arg1[%c0, %c0_8] : memref<8x128xf32, #tpu.memory_space<vmem>>, vector<8x128xf32>
    %32 = vector.broadcast %21 : vector<1x128xf32> to vector<8x128xf32>
    %33 = arith.maximumf %31, %32 : vector<8x128xf32>
    %34 = vector.broadcast %30 : vector<1x128xf32> to vector<8x128xf32>
    %35 = arith.minimumf %33, %34 : vector<8x128xf32>
    %c0_9 = arith.constant 0 : index
    %c0_10 = arith.constant 0 : index
    %36 = vector.load %arg2[%c0_9, %c0_10] : memref<8x128xf32, #tpu.memory_space<vmem>>, vector<8x128xf32>
    tpu.vector_store %arg2[%c0_9, %c0_10], %35 {strides = array<i32>} : memref<8x128xf32, #tpu.memory_space<vmem>>, vector<8x128xf32>,
    return
  }
  func.func @transform_0(%arg0: i32) -> (i32, i32) {
    %c0_i32 = arith.constant 0 : i32
    %c0_i32_0 = arith.constant 0 : i32
    return %arg0, %c0_i32 : i32, i32
  }
  func.func @transform_1(%arg0: i32) -> (i32, i32) {
    %c0_i32 = arith.constant 0 : i32
    %c0_i32_0 = arith.constant 0 : i32
    return %arg0, %c0_i32 : i32, i32
  }
}

</mosaic_0001>

<bundles_post_ra>
// kernel: tpu_custom_call.1
= control target key start
LH: loop header
LB: loop body
LE: loop exit
PB: predicated region body
PF: predicated region fallthrough
CT: control target
= control target key end

     0   :  { %6 = vsyncpa [#allocation3], 0  ;;  %s148_s0 = inlined_call_operand.hbm [shape: f32[1,128], index: 0, kind: input, shape index: {}, may-alias: {0,1}]   ;;  %s149_s1 = inlined_call_operand.hbm [shape: f32[1,128], index: 1, kind: output, shape index: {}, may-alias: {0,1}]  }
   0x1   :  { %7 = vsyncpa [#allocation4], 0 }
   0x2   :  { %11 = vsyncadd [#allocation3], 112  ;;  %s12_s8 = sshll.u32 %s148_s0, 4  ;;  %s126_s9 = smov [#allocation2]   ;;  %s13_s8 = int_to_ptr.hbm [resolvable:$true] %s12_s8 }
   0x3   :  { %s14_s10 = sshll.u32 %s126_s9, 4  ;;  %s127_s11 = smov 16   ;;  %s15_s10 = int_to_ptr.vmem [resolvable:$true] %s14_s10 }
   0x4   :  { %s128_s12 = smov 1  }
   0x5   :  { %20 = dma.hbm_to_vmem [thread:$0]  %s13_s8, 16, %s15_s10, [#allocation3], %s127_s11, %s127_s11, %s128_s12  }
   0x6   :  { %122 = dma.done.wait [#allocation3], 128  }
   0x7   :  { %123 = vsyncadd [#allocation3], 4294967168  ;;  %v25_v0 = vlaneseq  ;;  %v129_v3 = vmov -inf   ;;  %v130_v5 = vmov inf   ;;  %v45_v7 = vld [vmem:[#allocation2] sm:$0xff] }
   0x9   :  { %v26_v1 = vand.u32 127, %v25_v0 }
   0xb   :  { %v31_v2 = vand.u32 3, %v26_v1 }
   0xd   :  { %vm39_vm0 = vcmp.lt.s32.totalorder %v31_v2, 2  ;;  %vm41_vm1 = vcmp.eq.s32.totalorder %v31_v2, 2  ;;  %vm42_vm2 = vcmp.eq.s32.totalorder %v31_v2, 3 }
   0xe   :  { %v40_v4 = vsel %vm39_vm0, 0.0, %v129_v3  ;;  %v43_v6 = vsel %vm42_vm2, 15.0, %v130_v5 }
   0xf   :  { %v44_v8 = vsel %vm41_vm1, 15.0, %v43_v6  ;;  %v46_v9 = vmax.f32 %v45_v7, %v40_v4 }
  0x11   :  { %v47_v10 = vmin.f32 %v46_v9, %v44_v8 }
  0x13   :  { %48 = vst [vmem:[#allocation5] sm:$0xff] %v47_v10 }
  0x14   :  { %52 = vsyncadd [#allocation4], 112  ;;  %s55_s14 = sshll.u32 %s149_s1, 4  ;;  %s131_s15 = smov [#allocation5]   ;;  %s56_s14 = int_to_ptr.hbm [resolvable:$true] %s55_s14 }
  0x15   :  { %s53_s16 = sshll.u32 %s131_s15, 4  ;;  %s54_s16 = int_to_ptr.vmem [resolvable:$true] %s53_s16 }
  0x16   :  { %61 = dma.vmem_to_hbm [thread:$0]  %s54_s16, 16, %s56_s14, [#allocation4], %s127_s11, %s127_s11, %s128_s12  }
  0x17   :  { %124 = dma.done.wait [#allocation4], 128  }
  0x18   :  { %125 = vsyncadd [#allocation4], 4294967168 }
  0x19   :  { %66 = vsyncpa [#allocation3], 1 }
  0x1a   :  { %67 = vsyncpa [#allocation4], 1 }

</bundles_post_ra>
